<compile_context>
chip_gen: v7x
topology: tpu7x:2x2x1
jax: 0.10.0
libtpu: 0.0.40
codegen_flags: <defaults>
</compile_context>

<pallas_src>
import functools

import jax
import jax.numpy as jnp
from jax import lax
from jax.experimental import pallas as pl
from jax.experimental.pallas import tpu as pltpu


def _attention_kernel(x_ref, wqkv_ref, wo_ref, bo_ref, o_ref, qkv_ref, *,
                      heads, dim_head, seq_len):
    # Blocks:
    #   x_ref   : (1, N, dim)        full sequence, resident across q tiles
    #   wqkv_ref: (dim, 3*inner)     fused QKV weights (Q columns pre-scaled)
    #   wo_ref  : (inner, dim)       output-projection weights
    #   bo_ref  : (1, dim)           output-projection bias
    #   o_ref   : (1, tq, dim)       output tile
    #   qkv_ref : (n_pad, 3*inner)   VMEM scratch: cached QKV for this batch el.
    qi = pl.program_id(1)
    inner = heads * dim_head
    tq = o_ref.shape[1]
    n_pad = qkv_ref.shape[0]

    @pl.when(qi == 0)
    def _():
        # One wide MXU matmul projects Q, K, V for every head and the whole
        # sequence; cached across all query tiles of this batch element.
        if n_pad > seq_len:
            # Zero padded rows (ragged N) so garbage never reaches the output
            # path; padded query rows are masked on HBM writeback anyway.
            qkv_ref[...] = jnp.zeros_like(qkv_ref)
        qkv = jnp.dot(x_ref[0], wqkv_ref[...],
                      preferred_element_type=jnp.float32)          # (N, 3*inner)
        qkv_ref[0:seq_len, :] = qkv.astype(qkv_ref.dtype)

    row0 = pl.multiple_of(qi * tq, tq)

    outs = []
    for h in range(heads):                      # short static loop over heads
        c0 = h * dim_head
        q_h = qkv_ref[pl.ds(row0, tq), c0:c0 + dim_head]                 # (tq, dh)
        k_h = qkv_ref[0:seq_len, inner + c0:inner + c0 + dim_head]       # (N,  dh)
        v_h = qkv_ref[0:seq_len, 2 * inner + c0:2 * inner + c0 + dim_head]

        # Contract on the last axes directly (no explicit transpose).
        dots = lax.dot_general(q_h, k_h, (((1,), (1,)), ((), ())),
                               preferred_element_type=jnp.float32)       # (tq, N)
        m = jnp.max(dots, axis=-1, keepdims=True)
        p = jnp.exp(dots - m)
        l = jnp.sum(p, axis=-1, keepdims=True)
        out_h = jnp.dot(p.astype(v_h.dtype), v_h,
                        preferred_element_type=jnp.float32)              # (tq, dh)
        # Deferred normalization: cheap (tq, dh) multiply + EUP reciprocal.
        outs.append(out_h * pl.reciprocal(l, approx=True))

    out_cat = jnp.concatenate(outs, axis=-1)                             # (tq, inner)

    # Fused output projection with K = inner (all heads at once).
    y = jnp.dot(out_cat.astype(wo_ref.dtype), wo_ref[...],
                preferred_element_type=jnp.float32)                      # (tq, dim)
    o_ref[0] = (y + bo_ref[...].astype(jnp.float32)).astype(o_ref.dtype)


def attention(x, w_qkv, w_out, b_out, *, heads, dim_head, q_tile=128):
    """x: (B, N, dim); w_qkv: (3*heads*dim_head, dim) [torch Linear layout];
    w_out: (dim, heads*dim_head) or None (Identity path); b_out: (dim,)."""
    B, N, dim = x.shape
    inner = heads * dim_head
    assert w_qkv.shape == (3 * inner, dim)
    scale = float(dim_head) ** -0.5

    if w_out is None:  # project_out == False  (heads == 1 and dim_head == dim)
        w_out = jnp.eye(dim, dtype=x.dtype)
        b_out = jnp.zeros((dim,), dtype=x.dtype)

    # Wrapper-side weight plumbing (free relative to the kernel):
    #   to_qkv: y = x @ W^T ; column index = s*inner + h*dh + d, s in {q,k,v}.
    #   Fold the softmax scale into the Q columns so the kernel never scales.
    wqkv_slab = jnp.transpose(w_qkv).astype(jnp.float32)            # (dim, 3*inner)
    wqkv_slab = wqkv_slab.at[:, :inner].multiply(scale)
    wqkv_slab = wqkv_slab.astype(x.dtype)
    #   to_out: y = o @ Wout^T ; row index = h*dh + d.
    wo_slab = jnp.transpose(w_out).astype(x.dtype)                  # (inner, dim)
    bo = jnp.asarray(b_out, x.dtype).reshape(1, dim)

    # Query-row tiling: full sequence if small, otherwise fixed tiles; padded
    # query rows (ragged N) are masked on writeback by the out BlockSpec.
    tq = N if N <= q_tile else q_tile
    n_q = pl.cdiv(N, tq)
    n_pad = n_q * tq
    grid = (B, n_q)

    flops = 2 * B * (N * dim * 3 * inner              # fused QKV projection
                     + 2 * heads * N * N * dim_head   # q@k^T + p@v
                     + N * inner * dim)               # output projection
    cost = pl.CostEstimate(
        flops=flops,
        transcendentals=B * heads * N * N,
        bytes_accessed=(2 * B * N * dim + 4 * dim * inner + dim) * x.dtype.itemsize,
    )

    kernel = functools.partial(_attention_kernel,
                               heads=heads, dim_head=dim_head, seq_len=N)

    return pl.pallas_call(
        kernel,
        out_shape=jax.ShapeDtypeStruct((B, N, dim), x.dtype),
        grid_spec=pltpu.PrefetchScalarGridSpec(
            num_scalar_prefetch=0,
            grid=grid,
            in_specs=[
                # Full sequence x; block index constant across qi -> one DMA per b.
                pl.BlockSpec((1, N, dim), lambda b, qi: (b, 0, 0)),
                # Weight slabs: grid-invariant indices -> VMEM-resident, no re-DMA.
                pl.BlockSpec((dim, 3 * inner), lambda b, qi: (0, 0)),
                pl.BlockSpec((inner, dim), lambda b, qi: (0, 0)),
                pl.BlockSpec((1, dim), lambda b, qi: (0, 0)),
            ],
            out_specs=pl.BlockSpec((1, tq, dim), lambda b, qi: (b, qi, 0)),
            scratch_shapes=[pltpu.VMEM((n_pad, 3 * inner), x.dtype)],
        ),
        compiler_params=pltpu.CompilerParams(
            # qi must be serial ("arbitrary") so the per-batch QKV cache filled
            # under pl.when(qi == 0) is valid for later q tiles of the same b.
            dimension_semantics=("parallel", "arbitrary"),
        ),
        cost_estimate=cost,
    )(x, wqkv_slab, wo_slab, bo)


def attention_ref(x, w_qkv, w_out, b_out, *, heads, dim_head):
    """Pure-JAX reference mirroring the PyTorch forward."""
    B, N, dim = x.shape
    scale = float(dim_head) ** -0.5
    qkv = x @ w_qkv.T                                              # (B, N, 3*inner)
    q, k, v = jnp.split(qkv, 3, axis=-1)

    def split_heads(t):
        return jnp.transpose(t.reshape(B, N, heads, dim_head), (0, 2, 1, 3))

    q, k, v = split_heads(q), split_heads(k), split_heads(v)
    dots = jnp.einsum("bhnd,bhmd->bhnm", q, k) * scale
    attn = jax.nn.softmax(dots, axis=-1)
    out = jnp.einsum("bhnm,bhmd->bhnd", attn, v)
    out = jnp.transpose(out, (0, 2, 1, 3)).reshape(B, N, heads * dim_head)
    return out @ w_out.T + b_out


if __name__ == "__main__":
    # Small shapes consistent with the module: batch=2, seq=16, dim=32,
    # heads=4, dim_head=16 -> inner_dim=64 (project_out=True).
    B, N, dim = 2, 16, 32
    heads, dim_head = 4, 16
    inner = heads * dim_head

    key = jax.random.PRNGKey(0)
    kx, kq, ko, kb = jax.random.split(key, 4)
    x = jax.random.normal(kx, (B, N, dim), dtype=jnp.float32)
    w_qkv = jax.random.normal(kq, (3 * inner, dim), dtype=jnp.float32) * 0.1
    w_out = jax.random.normal(ko, (dim, inner), dtype=jnp.float32) * 0.1
    b_out = jax.random.normal(kb, (dim,), dtype=jnp.float32) * 0.1

    out = attention(x, w_qkv, w_out, b_out, heads=heads, dim_head=dim_head)
    out = jax.block_until_ready(out)

    ref = attention_ref(x, w_qkv, w_out, b_out, heads=heads, dim_head=dim_head)
    assert out.shape == (B, N, dim)
    assert jnp.allclose(out, ref, atol=2e-3, rtol=2e-3), "mismatch vs reference"

    print("KERNEL_OK")
</pallas_src>

<mosaic_0001>
module attributes {stable_mosaic.version = 11 : i64} {
  func.func @_attention_kernel(%arg0: i32, %arg1: i32, %arg2: memref<1x16x32xf32, #tpu.memory_space<vmem>>, %arg3: memref<32x192xf32, #tpu.memory_space<vmem>>, %arg4: memref<64x32xf32, #tpu.memory_space<vmem>>, %arg5: memref<1x32xf32, #tpu.memory_space<vmem>>, %arg6: memref<1x16x32xf32, #tpu.memory_space<vmem>>, %arg7: memref<16x192xf32, #tpu.memory_space<vmem>>) attributes {dimension_semantics = [#tpu.dimension_semantics<parallel>, #tpu.dimension_semantics<arbitrary>], iteration_bounds = array<i64: 2, 1>, scalar_prefetch = 0 : i64, scratch_operands = 1 : i64, tpu.core_type = #tpu.core_type<tc>, window_params = [{transform_indices = @transform_0, window_bounds = array<i64: 1, 16, 32>}, {pipeline_mode = #tpu.pipeline_mode<synchronous>, transform_indices = @transform_1, window_bounds = array<i64: 32, 192>}, {pipeline_mode = #tpu.pipeline_mode<synchronous>, transform_indices = @transform_2, window_bounds = array<i64: 64, 32>}, {pipeline_mode = #tpu.pipeline_mode<synchronous>, transform_indices = @transform_3, window_bounds = array<i64: 1, 32>}, {transform_indices = @transform_4, window_bounds = array<i64: 1, 16, 32>}]} {
    %c0_i32 = arith.constant 0 : i32
    %0 = arith.cmpi eq, %arg1, %c0_i32 : i32
    %1 = arith.extui %0 : i1 to i32
    %c0_i32_0 = arith.constant 0 : i32
    %2 = arith.cmpi ne, %1, %c0_i32_0 : i32
    scf.if %2 {
      %c0_32 = arith.constant 0 : index
      %c0_33 = arith.constant 0 : index
      %c0_34 = arith.constant 0 : index
      %78 = vector.load %arg2[%c0_32, %c0_33, %c0_34] : memref<1x16x32xf32, #tpu.memory_space<vmem>>, vector<1x16x32xf32>
      %79 = vector.shape_cast %78 : vector<1x16x32xf32> to vector<16x32xf32>
      %c0_35 = arith.constant 0 : index
      %c0_36 = arith.constant 0 : index
      %80 = vector.load %arg3[%c0_35, %c0_36] : memref<32x192xf32, #tpu.memory_space<vmem>>, vector<32x192xf32>
      %cst_37 = arith.constant dense<0.000000e+00> : vector<16x192xf32>
      %81 = tpu.matmul %79, %80, %cst_37 {dimension_numbers = #tpu.dot_dimension_numbers<[1], [0], [0], [1], [0, 0, 1, 1], [], []>} : vector<16x32xf32>, vector<32x192xf32>, vector<16x192xf32> -> vector<16x192xf32>
      %c0_38 = arith.constant 0 : index
      %c0_39 = arith.constant 0 : index
      %82 = vector.load %arg7[%c0_38, %c0_39] : memref<16x192xf32, #tpu.memory_space<vmem>>, vector<16x192xf32>
      tpu.vector_store %arg7[%c0_38, %c0_39], %81 {strides = array<i32>} : memref<16x192xf32, #tpu.memory_space<vmem>>, vector<16x192xf32>,
    } else {
    }
    %c16_i32 = arith.constant 16 : i32
    %3 = arith.muli %arg1, %c16_i32 : i32
    %4 = tpu.assume_multiple %3, 16 : i32
    %5 = arith.index_cast %4 : i32 to index
    %c0 = arith.constant 0 : index
    %6 = vector.load %arg7[%5, %c0] : memref<16x192xf32, #tpu.memory_space<vmem>>, vector<16x16xf32>
    %c0_1 = arith.constant 0 : index
    %c64 = arith.constant 64 : index
    %7 = vector.load %arg7[%c0_1, %c64] : memref<16x192xf32, #tpu.memory_space<vmem>>, vector<16x16xf32>
    %c0_2 = arith.constant 0 : index
    %c128 = arith.constant 128 : index
    %8 = vector.load %arg7[%c0_2, %c128] : memref<16x192xf32, #tpu.memory_space<vmem>>, vector<16x16xf32>
    %cst = arith.constant dense<0.000000e+00> : vector<16x16xf32>
    %9 = tpu.matmul %6, %7, %cst {dimension_numbers = #tpu.dot_dimension_numbers<[1], [1], [0], [0], [0, 0, 1, 0], [], []>} : vector<16x16xf32>, vector<16x16xf32>, vector<16x16xf32> -> vector<16x16xf32>
    %cst_3 = arith.constant dense<0xFF800000> : vector<16xf32>
    %10 = vector.multi_reduction <maximumf>, %9, %cst_3 [1] : vector<16x16xf32> to vector<16xf32>
    %11 = vector.shape_cast %10 : vector<16xf32> to vector<16x1xf32>
    %12 = vector.broadcast %11 : vector<16x1xf32> to vector<16x16xf32>
    %13 = arith.subf %9, %12 : vector<16x16xf32>
    %14 = math.exp %13 : vector<16x16xf32>
    %cst_4 = arith.constant dense<0.000000e+00> : vector<16xf32>
    %15 = vector.multi_reduction <add>, %14, %cst_4 [1] : vector<16x16xf32> to vector<16xf32>
    %16 = vector.shape_cast %15 : vector<16xf32> to vector<16x1xf32>
    %cst_5 = arith.constant dense<0.000000e+00> : vector<16x16xf32>
    %17 = tpu.matmul %14, %8, %cst_5 {dimension_numbers = #tpu.dot_dimension_numbers<[1], [0], [0], [1], [0, 0, 1, 1], [], []>} : vector<16x16xf32>, vector<16x16xf32>, vector<16x16xf32> -> vector<16x16xf32>
    %18 = tpu.reciprocal %16 {approx = true} : vector<16x1xf32> -> vector<16x1xf32>
    %19 = vector.broadcast %18 : vector<16x1xf32> to vector<16x16xf32>
    %20 = arith.mulf %17, %19 : vector<16x16xf32>
    %21 = arith.index_cast %4 : i32 to index
    %c16 = arith.constant 16 : index
    %22 = vector.load %arg7[%21, %c16] : memref<16x192xf32, #tpu.memory_space<vmem>>, vector<16x16xf32>
    %c0_6 = arith.constant 0 : index
    %c80 = arith.constant 80 : index
    %23 = vector.load %arg7[%c0_6, %c80] : memref<16x192xf32, #tpu.memory_space<vmem>>, vector<16x16xf32>
    %c0_7 = arith.constant 0 : index
    %c144 = arith.constant 144 : index
    %24 = vector.load %arg7[%c0_7, %c144] : memref<16x192xf32, #tpu.memory_space<vmem>>, vector<16x16xf32>
    %cst_8 = arith.constant dense<0.000000e+00> : vector<16x16xf32>
    %25 = tpu.matmul %22, %23, %cst_8 {dimension_numbers = #tpu.dot_dimension_numbers<[1], [1], [0], [0], [0, 0, 1, 0], [], []>} : vector<16x16xf32>, vector<16x16xf32>, vector<16x16xf32> -> vector<16x16xf32>
    %cst_9 = arith.constant dense<0xFF800000> : vector<16xf32>
    %26 = vector.multi_reduction <maximumf>, %25, %cst_9 [1] : vector<16x16xf32> to vector<16xf32>
    %27 = vector.shape_cast %26 : vector<16xf32> to vector<16x1xf32>
    %28 = vector.broadcast %27 : vector<16x1xf32> to vector<16x16xf32>
    %29 = arith.subf %25, %28 : vector<16x16xf32>
    %30 = math.exp %29 : vector<16x16xf32>
    %cst_10 = arith.constant dense<0.000000e+00> : vector<16xf32>
    %31 = vector.multi_reduction <add>, %30, %cst_10 [1] : vector<16x16xf32> to vector<16xf32>
    %32 = vector.shape_cast %31 : vector<16xf32> to vector<16x1xf32>
    %cst_11 = arith.constant dense<0.000000e+00> : vector<16x16xf32>
    %33 = tpu.matmul %30, %24, %cst_11 {dimension_numbers = #tpu.dot_dimension_numbers<[1], [0], [0], [1], [0, 0, 1, 1], [], []>} : vector<16x16xf32>, vector<16x16xf32>, vector<16x16xf32> -> vector<16x16xf32>
    %34 = tpu.reciprocal %32 {approx = true} : vector<16x1xf32> -> vector<16x1xf32>
    %35 = vector.broadcast %34 : vector<16x1xf32> to vector<16x16xf32>
    %36 = arith.mulf %33, %35 : vector<16x16xf32>
    %37 = arith.index_cast %4 : i32 to index
    %c32 = arith.constant 32 : index
    %38 = vector.load %arg7[%37, %c32] : memref<16x192xf32, #tpu.memory_space<vmem>>, vector<16x16xf32>
    %c0_12 = arith.constant 0 : index
    %c96 = arith.constant 96 : index
    %39 = vector.load %arg7[%c0_12, %c96] : memref<16x192xf32, #tpu.memory_space<vmem>>, vector<16x16xf32>
    %c0_13 = arith.constant 0 : index
    %c160 = arith.constant 160 : index
    %40 = vector.load %arg7[%c0_13, %c160] : memref<16x192xf32, #tpu.memory_space<vmem>>, vector<16x16xf32>
    %cst_14 = arith.constant dense<0.000000e+00> : vector<16x16xf32>
    %41 = tpu.matmul %38, %39, %cst_14 {dimension_numbers = #tpu.dot_dimension_numbers<[1], [1], [0], [0], [0, 0, 1, 0], [], []>} : vector<16x16xf32>, vector<16x16xf32>, vector<16x16xf32> -> vector<16x16xf32>
    %cst_15 = arith.constant dense<0xFF800000> : vector<16xf32>
    %42 = vector.multi_reduction <maximumf>, %41, %cst_15 [1] : vector<16x16xf32> to vector<16xf32>
    %43 = vector.shape_cast %42 : vector<16xf32> to vector<16x1xf32>
    %44 = vector.broadcast %43 : vector<16x1xf32> to vector<16x16xf32>
    %45 = arith.subf %41, %44 : vector<16x16xf32>
    %46 = math.exp %45 : vector<16x16xf32>
    %cst_16 = arith.constant dense<0.000000e+00> : vector<16xf32>
    %47 = vector.multi_reduction <add>, %46, %cst_16 [1] : vector<16x16xf32> to vector<16xf32>
    %48 = vector.shape_cast %47 : vector<16xf32> to vector<16x1xf32>
    %cst_17 = arith.constant dense<0.000000e+00> : vector<16x16xf32>
    %49 = tpu.matmul %46, %40, %cst_17 {dimension_numbers = #tpu.dot_dimension_numbers<[1], [0], [0], [1], [0, 0, 1, 1], [], []>} : vector<16x16xf32>, vector<16x16xf32>, vector<16x16xf32> -> vector<16x16xf32>
    %50 = tpu.reciprocal %48 {approx = true} : vector<16x1xf32> -> vector<16x1xf32>
    %51 = vector.broadcast %50 : vector<16x1xf32> to vector<16x16xf32>
    %52 = arith.mulf %49, %51 : vector<16x16xf32>
    %53 = arith.index_cast %4 : i32 to index
    %c48 = arith.constant 48 : index
    %54 = vector.load %arg7[%53, %c48] : memref<16x192xf32, #tpu.memory_space<vmem>>, vector<16x16xf32>
    %c0_18 = arith.constant 0 : index
    %c112 = arith.constant 112 : index
    %55 = vector.load %arg7[%c0_18, %c112] : memref<16x192xf32, #tpu.memory_space<vmem>>, vector<16x16xf32>
    %c0_19 = arith.constant 0 : index
    %c176 = arith.constant 176 : index
    %56 = vector.load %arg7[%c0_19, %c176] : memref<16x192xf32, #tpu.memory_space<vmem>>, vector<16x16xf32>
    %cst_20 = arith.constant dense<0.000000e+00> : vector<16x16xf32>
    %57 = tpu.matmul %54, %55, %cst_20 {dimension_numbers = #tpu.dot_dimension_numbers<[1], [1], [0], [0], [0, 0, 1, 0], [], []>} : vector<16x16xf32>, vector<16x16xf32>, vector<16x16xf32> -> vector<16x16xf32>
    %cst_21 = arith.constant dense<0xFF800000> : vector<16xf32>
    %58 = vector.multi_reduction <maximumf>, %57, %cst_21 [1] : vector<16x16xf32> to vector<16xf32>
    %59 = vector.shape_cast %58 : vector<16xf32> to vector<16x1xf32>
    %60 = vector.broadcast %59 : vector<16x1xf32> to vector<16x16xf32>
    %61 = arith.subf %57, %60 : vector<16x16xf32>
    %62 = math.exp %61 : vector<16x16xf32>
    %cst_22 = arith.constant dense<0.000000e+00> : vector<16xf32>
    %63 = vector.multi_reduction <add>, %62, %cst_22 [1] : vector<16x16xf32> to vector<16xf32>
    %64 = vector.shape_cast %63 : vector<16xf32> to vector<16x1xf32>
    %cst_23 = arith.constant dense<0.000000e+00> : vector<16x16xf32>
    %65 = tpu.matmul %62, %56, %cst_23 {dimension_numbers = #tpu.dot_dimension_numbers<[1], [0], [0], [1], [0, 0, 1, 1], [], []>} : vector<16x16xf32>, vector<16x16xf32>, vector<16x16xf32> -> vector<16x16xf32>
    %66 = tpu.reciprocal %64 {approx = true} : vector<16x1xf32> -> vector<16x1xf32>
    %67 = vector.broadcast %66 : vector<16x1xf32> to vector<16x16xf32>
    %68 = arith.mulf %65, %67 : vector<16x16xf32>
    %69 = tpu.concatenate %20, %36, %52, %68 in 1 : vector<16x16xf32>, vector<16x16xf32>, vector<16x16xf32>, vector<16x16xf32> -> vector<16x64xf32>
    %c0_24 = arith.constant 0 : index
    %c0_25 = arith.constant 0 : index
    %70 = vector.load %arg4[%c0_24, %c0_25] : memref<64x32xf32, #tpu.memory_space<vmem>>, vector<64x32xf32>
    %cst_26 = arith.constant dense<0.000000e+00> : vector<16x32xf32>
    %71 = tpu.matmul %69, %70, %cst_26 {dimension_numbers = #tpu.dot_dimension_numbers<[1], [0], [0], [1], [0, 0, 1, 1], [], []>} : vector<16x64xf32>, vector<64x32xf32>, vector<16x32xf32> -> vector<16x32xf32>
    %c0_27 = arith.constant 0 : index
    %c0_28 = arith.constant 0 : index
    %72 = vector.load %arg5[%c0_27, %c0_28] : memref<1x32xf32, #tpu.memory_space<vmem>>, vector<1x32xf32>
    %73 = vector.broadcast %72 : vector<1x32xf32> to vector<16x32xf32>
    %74 = arith.addf %71, %73 : vector<16x32xf32>
    %c0_29 = arith.constant 0 : index
    %c0_30 = arith.constant 0 : index
    %c0_31 = arith.constant 0 : index
    %75 = vector.load %arg6[%c0_29, %c0_30, %c0_31] : memref<1x16x32xf32, #tpu.memory_space<vmem>>, vector<1x16x32xf32>
    %76 = vector.shape_cast %75 : vector<1x16x32xf32> to vector<16x32xf32>
    %77 = vector.shape_cast %74 : vector<16x32xf32> to vector<1x16x32xf32>
    tpu.vector_store %arg6[%c0_29, %c0_30, %c0_31], %77 {strides = array<i32>} : memref<1x16x32xf32, #tpu.memory_space<vmem>>, vector<1x16x32xf32>,
    return
  }
  func.func @transform_0(%arg0: i32, %arg1: i32) -> (i32, i32, i32) {
    %c0_i32 = arith.constant 0 : i32
    %c0_i32_0 = arith.constant 0 : i32
    %c0_i32_1 = arith.constant 0 : i32
    return %arg0, %c0_i32, %c0_i32_0 : i32, i32, i32
  }
  func.func @transform_1(%arg0: i32, %arg1: i32) -> (i32, i32) {
    %c0_i32 = arith.constant 0 : i32
    %c0_i32_0 = arith.constant 0 : i32
    %c0_i32_1 = arith.constant 0 : i32
    return %c0_i32, %c0_i32_0 : i32, i32
  }
  func.func @transform_2(%arg0: i32, %arg1: i32) -> (i32, i32) {
    %c0_i32 = arith.constant 0 : i32
    %c0_i32_0 = arith.constant 0 : i32
    %c0_i32_1 = arith.constant 0 : i32
    return %c0_i32, %c0_i32_0 : i32, i32
  }
  func.func @transform_3(%arg0: i32, %arg1: i32) -> (i32, i32) {
    %c0_i32 = arith.constant 0 : i32
    %c0_i32_0 = arith.constant 0 : i32
    %c0_i32_1 = arith.constant 0 : i32
    return %c0_i32, %c0_i32_0 : i32, i32
  }
  func.func @transform_4(%arg0: i32, %arg1: i32) -> (i32, i32, i32) {
    %c0_i32 = arith.constant 0 : i32
    %c0_i32_0 = arith.constant 0 : i32
    return %arg0, %arg1, %c0_i32 : i32, i32, i32
  }
}

</mosaic_0001>

<bundles_post_ra>
// kernel: tpu_custom_call.1
= control target key start
LH: loop header
LB: loop body
LE: loop exit
PB: predicated region body
PF: predicated region fallthrough
CT: control target
= control target key end

     0   :  { %9 = vsyncpa [#allocation4], 0  ;;  %s2107_s0 = inlined_call_operand.vmem [shape: f32[2,16,32], index: 0, kind: input, shape index: {}]   ;;  %s2108_s1 = inlined_call_operand.vmem [shape: f32[32,192], index: 1, kind: input, shape index: {}]   ;;  %s2109_s2 = inlined_call_operand.vmem [shape: f32[64,32], index: 2, kind: input, shape index: {}]   ;;  %s2110_s3 = inlined_call_operand.vmem [shape: f32[1,32], index: 3, kind: input, shape index: {}]   ;;  %s2111_s4 = inlined_call_operand.hbm [shape: f32[2,16,32], index: 4, kind: output, shape index: {}]  }
   0x1   :  { %11 = vsyncpa [#allocation4 + $0x1], 0  ;;  %s1818_s15 = smov 0   ;;  %s1820_s16 = smov 0  }
   0x2   :  { %s1822_s17 = smov 0   ;;  %s1824_s18 = smov 0  }
   0x3   :  { %s1826_s19 = smov 0   ;;  %s1828_s20 = smov 0  }
   0x4 LB: > { %s1345_s21 = sadd.s32 4294967295, %s1780_s20   ;;  %s1346_s22 = sadd.s32 4294967294, %s1780_s20   ;;  %s1780_s20 = sphi %s1828_s20, %s17_s20   ;;  %s1776_s19 = sphi %s1826_s19, %s2120_s19   ;;  %s1772_s18 = sphi %s1824_s18, %s2119_s18   ;;  %s1768_s17 = sphi %s1822_s17, %s2118_s17   ;;  %s1764_s16 = sphi %s1820_s16, %s2117_s16   ;;  %s1760_s15 = sphi %s1818_s15, %s2116_s15  }
   0x5   : > { %s29_s23 = sadd.s32 1, %s1776_s19  ;;  %s127_s24 = sadd.s32 1, %s1768_s17 }
   0x6   : > { %p31_p0 = scmp.ge.s32.totalorder %s29_s23, 2  ;;  %p137_p1 = scmp.ne.s32.totalorder %s1768_s17, %s1764_s16 }
   0x7   : > { %p138_p2 = scmp.eq.s32.totalorder %s1345_s21, 1  ;;  %p143_p3 = scmp.ne.s32.totalorder %s1764_s16, %s1760_s15 }
   0x8   : > { %s2122_s23 = smov (%p31_p0, %s29_s23), 0  ;;  %p144_p5 = scmp.eq.s32.totalorder %s1346_s22, 1 }
   0x9   : > { %p1858_p4 = por %p138_p2, %p137_p1  ;;  %s122_s26 = ssub.s32 %s1776_s19, %s2122_s23 }
   0xa   : > { %p1349_p6 = scmp.ge.s32.totalorder %s1780_s20, 1  ;;  %p125_p7 = scmp.eq.s32.totalorder %s122_s26, 0 }
   0xb   : > { %p1865_p8 = por %p144_p5, %p143_p3  ;;  %p179_p9 = scmp.lt.s32.totalorder %s1780_s20, 3 }
   0xc   : > { %s1871_s28 = scalar_select %p125_p7, %s1768_s17, %s127_s24  }
   0xd   : > { %p180_p10 = pnand %p1349_p6, %p179_p9 }
   0xe   : > { %v218_v0 = vld [vmem:[%s2108_s1 + $0x8] sm:$0xff] (!%p180_p10)  ;;  %v220_v1 = vld [vmem:[%s2108_s1 + $0x18] sm:$0xff] (!%p180_p10)  ;;  %v217_v2 = vld [vmem:[%s2108_s1] sm:$0xff] (!%p180_p10)  ;;  %p205_p11 = scmp.lt.s32.totalorder (!%p180_p10), %s1772_s18, 1  ;;  %v1782_v7 = vmov (!%p180_p10), 0.0   ;;  %vm225_vm0 = vcmask (!%p180_p10), 261120  }
   0xf   : > { %183 = sbr.rel (%p180_p10) target bundleno = 1709 (0x6ad), region = 36  ;;  %v1506_v3 = vpack.c.bf16 (!%p180_p10), %v220_v1, %v218_v0  ;;  %v219_v4 = vld [vmem:[%s2108_s1 + $0x10] sm:$0xff] (!%p180_p10)  ;;  %v222_v5 = vld [vmem:[%s2108_s1 + $0x28] sm:$0xff] (!%p180_p10)  ;;  %v224_v6 = vld [vmem:[%s2108_s1 + $0x38] sm:$0xff] (!%p180_p10)  ;;  %296 = vmatprep.mubr.f32.mxu1 (!%p180_p10), %v1782_v7  ;;  %vm332_vm1 = vcmask (!%p180_p10), 130048   ;;  %vm310_vm2 = vcmask (!%p180_p10), 523264  }
  0x10   : > { %v1508_v8 = vpack.c.bf16 (!%p180_p10), %v219_v4, %v217_v2  ;;  %v1510_v9 = vpack.c.bf16 (!%p180_p10), %v224_v6, %v222_v5  ;;  %v221_v10 = vld [vmem:[%s2108_s1 + $0x20] sm:$0xff] (!%p180_p10)  ;;  %v223_v11 = vld [vmem:[%s2108_s1 + $0x30] sm:$0xff] (!%p180_p10)  ;;  %s1783_s8 = smov (!%p180_p10), 112   ;;  %s1784_s9 = smov (!%p180_p10), 32   ;;  %vm1934_vm3 = vmpackc.low (!%p180_p10), %vm332_vm1, %vm332_vm1  ;;  %vm1152_vm4 = vcmask (!%p180_p10), 392192  }
  0x11   : > { %1507 = vmatprep.subr.bf16.mxu1 (!%p180_p10), %v1506_v3  ;;  %v1512_v12 = vpack.c.bf16 (!%p180_p10), %v223_v11, %v221_v10  ;;  %s1785_s10 = smov (!%p180_p10), 64   ;;  %s1786_s11 = smov (!%p180_p10), 96  }
  0x12   : > { %1509 = vmatpush1.bf16.msra.mxu1 (!%p180_p10), %v1508_v8  ;;  %s1787_s12 = smov (!%p180_p10), 48   ;;  %s1788_s13 = smov (!%p180_p10), 16  }
  0x13   : > { %1511 = vmatprep.subr.bf16.mxu1 (!%p180_p10), %v1510_v9  ;;  %s1789_s14 = smov (!%p180_p10), 80   ;;  %s1388_s5 = sshll.u32 (!%p180_p10), %s1772_s18, 8 }
  0x16   : > { %s206_s29 = scalar_select %p205_p11, %s1772_s18, 1  ;;  %1513 = vmatpush1.bf16.msra.mxu1 %v1512_v12 }
  0x18   : > { %s1387_s30 = sshll.u32 %s206_s29, 4 }
  0x19   : > { %s209_s7 = scalar_lea.vmem %s2107_s0, %s1387_s30 }
  0x1a   : > { %v215_v13 = vld [vmem:[%s209_s7] sm:$0xff]  ;;  %v216_v14 = vld [vmem:[%s209_s7 + $0x8] sm:$0xff] }
  0x1b   : > { %1353 = vmatmul.mubr.msk.f32.vlgmr.msra.gmra.mrb[0].mxu1 %vm225_vm0, %v215_v13 }
  0x1c   : > { %302 = vmatprep.mubr.f32.mxu1 %v1782_v7 }
  0x1f   : > { %1354 = vmatmul.mubr.msk.f32.gmra.mrb[2].mxu1 %vm225_vm0, %v216_v14 }
  0xee   : > { %v1904_v15 = vpop.f32.mrb[0].mxu1 }
  0xef   : > { %v300_v16 = vpop.f32.mrb[1].mxu1  ;;  %521 = vrot.lane.b32.xlu1 %v1904_v15, %s1783_s8  ;;  %1435 = vmatprep.mubr.msk.f32.mxu1 %vm332_vm1, %v1904_v15 }
  0xf0   : > { %311 = vst.msk [vmem:[#allocation2 + $0x8] sm:$0xff] %vm310_vm2, %v300_v16 }
  0xf2   : > { %v1911_v17 = vpop.f32.mrb[2].mxu1 }
  0xf3   : > { %v306_v18 = vpop.f32.mrb[3].mxu1  ;;  %v1915_v19 = vpack.i.bf16 %v1911_v17, %v1904_v15 }
  0xf4   : > { %313 = vst.msk [vmem:[#allocation2 + $0x18] sm:$0xff] %vm310_vm2, %v306_v18 }
  0xf5   : > { %1646 = vrot.lane.b32.xlu1 %v1915_v19, %s1784_s9  ;;  %1636 = vrot.lane.b32.xlu0 %v1915_v19, %s1785_s10  ;;  %s1790_s10 = smov [#allocation3]  }
  0xf7   : > { %v324_v20 = vld [vmem:[#allocation2 + $0x8] sm:$0xff] }
  0xf9   : > { %723 = vrot.lane.b32.xlu1 %v1904_v15, %s1786_s11  ;;  %1641 = vrot.lane.b32.xlu0 %v1915_v19, %s1787_s12 }
  0xfb   : > { %v325_v21 = vld [vmem:[#allocation2 + $0x18] sm:$0xff] }
  0xfc   : > { %v1925_v22 = vpack.i.bf16 %v325_v21, %v324_v20  ;;  %v1520_v31 = vpack.c.bf16 %v325_v21, %v324_v20 }
  0xfd   : > { %523 = vrot.lane.b32.xlu0 %v1911_v17, %s1783_s8 }
 0x101   : > { %725 = vrot.lane.b32.xlu0 %v1911_v17, %s1786_s11 }
 0x161   : > { %v522_v23 = vpop.permute.xlu1 %521 }
 0x162   : > { %1449 = vmatprep.mubr.msk.f32.mxu0 %vm332_vm1, %v522_v23 }
 0x167   : > { %v1637_v24 = vpop.permute.xlu0 %1636  ;;  %v1647_v27 = vpop.permute.xlu1 %1646 }
 0x168   : > { %v1639_v25 = vunpack.i.h.bf16 %v1637_v24  ;;  %v1638_v26 = vunpack.i.l.bf16 %v1637_v24  ;;  %v1649_v32 = vunpack.i.h.bf16 %v1647_v27  ;;  %v1648_v33 = vunpack.i.l.bf16 %v1647_v27 }
 0x16a   : > { %v1514_v29 = vpack.c.bf16 %v1639_v25, %v1638_v26  ;;  %v1534_v37 = vpack.c.bf16 %v1649_v32, %v1648_v33 }
 0x16b   : > { %v1642_v30 = vpop.permute.xlu0 %1641  ;;  %v724_v39 = vpop.permute.xlu1 %723 }
 0x16c   : > { %v1644_v34 = vunpack.i.h.bf16 %v1642_v30  ;;  %v1643_v35 = vunpack.i.l.bf16 %v1642_v30  ;;  %1516 = vmatprep.subr.msk.bf16.mxu1 %vm1934_vm3, %v1514_v29 }
 0x16d   : > { %1519 = vmatpush3.bf16.xpose.msk.msra.mxu1 %vm1934_vm3, %v1514_v29 }
 0x16e   : > { %1521 = vmatprep.subr.bf16.mxu1 %v1520_v31  ;;  %v1524_v36 = vpack.c.bf16 %v1644_v34, %v1643_v35 }
 0x16f   : > { %v524_v38 = vpop.permute.xlu0 %523 }
 0x170   : > { %1526 = vmatprep.subr.msk.bf16.mxu0 %vm1934_vm3, %v1524_v36 }
 0x171   : > { %1529 = vmatpush3.bf16.xpose.msk.msra.mxu0 %vm1934_vm3, %v1524_v36 }
 0x172   : > { %1536 = vmatprep.subr.msk.bf16.mxu0 %vm1934_vm3, %v1534_v37 }
 0x173   : > { %v726_v40 = vpop.permute.xlu0 %725 }
 0x174   : > { %1436 = vmatmul.mubr.msk.f32.vlgmr.msra.gmra.mrb[4].mxu1 %vm332_vm1, %v1911_v17 }
 0x175   : > { %1523 = vmatpush3.bf16.msra.mxu1 %v1520_v31 }
 0x178   : > { %1450 = vmatmul.mubr.msk.f32.vlgmr.msra.gmra.mrb[0].mxu0 %vm332_vm1, %v524_v38 }
 0x179   : > { %1539 = vmatpush3.bf16.xpose.msk.msra.mxu0 %vm1934_vm3, %v1534_v37  ;;  %1463 = vmatprep.mubr.msk.f32.mxu0 %vm332_vm1, %v724_v39 }
 0x180   : > { %1464 = vmatmul.mubr.msk.f32.vlgmr.msra.gmra.mrb[2].mxu0 %vm332_vm1, %v726_v40 }
 0x247   : > { %v1437_v41 = vpop.f32.mrb[4].mxu1 }
 0x248   : > { %v409_v42 = vpop.f32.mrb[5].mxu1  ;;  %v421_v43 = vsel %vm332_vm1, %v1437_v41, -inf }
 0x249   : > { %422 = vmax.xlane.f32.xlu0 %v421_v43  ;;  %v418_v48 = vsel %vm332_vm1, %v409_v42, -inf }
 0x24b   : > { %v1451_v44 = vpop.f32.mrb[0].mxu0 }
 0x24c   : > { %v603_v45 = vpop.f32.mrb[1].mxu0  ;;  %v615_v46 = vsel %vm332_vm1, %v1451_v44, -inf }
 0x24d   : > { %616 = vmax.xlane.f32.xlu1 %v615_v46  ;;  %v612_v47 = vsel %vm332_vm1, %v603_v45, -inf }
 0x24e   : > { %613 = vmax.xlane.f32.xlu0 %v612_v47 }
 0x251   : > { %419 = vmax.xlane.f32.xlu1 %v418_v48 }
 0x253   : > { %v1465_v49 = vpop.f32.mrb[2].mxu0 }
 0x254   : > { %v805_v50 = vpop.f32.mrb[3].mxu0  ;;  %v817_v51 = vsel %vm332_vm1, %v1465_v49, -inf }
 0x255   : > { %818 = vmax.xlane.f32.xlu1 %v817_v51  ;;  %v814_v52 = vsel %vm332_vm1, %v805_v50, -inf }
 0x256   : > { %815 = vmax.xlane.f32.xlu0 %v814_v52 }
 0x266   : > { %1656 = vrot.lane.b32.xlu1 %v1925_v22, %s1786_s11  ;;  %s1706_s11 = sshll.u32 %s1790_s10, 4  ;;  %s1707_s11 = int_to_ptr.vmem [resolvable:$false] %s1706_s11 }
 0x26a   : > { %1661 = vrot.lane.b32.xlu1 %v1915_v19, %s1788_s13 }
 0x26c   : > { %1651 = vrot.lane.b32.xlu0 %v1925_v22, %s1783_s8  ;;  %s2057_s8 = scalar_lea.hbm %s2111_s4, %s1388_s5 }
 0x26e   : > { %925 = vrot.lane.b32.xlu1 %v1911_v17, %s1789_s14 }
 0x270   : > { %923 = vrot.lane.b32.xlu0 %v1904_v15, %s1789_s14 }
 0x2d6   : > { %v423_v53 = vpop.xlane.xlu0 %422 }
 0x2d7   : > { %v425_v56 = vsub.f32 %v1437_v41, %v423_v53 }
 0x2d9   : > { %v428_v61 = vmul.f32 1.442695, %v425_v56 }
 0x2da   : > { %v617_v54 = vpop.xlane.xlu1 %616 }
 0x2db   : > { %v614_v55 = vpop.xlane.xlu0 %613  ;;  %v619_v59 = vsub.f32 %v1451_v44, %v617_v54 }
 0x2dc   : > { %v618_v57 = vsub.f32 %v603_v45, %v614_v55 }
 0x2dd   : > { %v622_v1 = vmul.f32 1.442695, %v619_v59 }
 0x2de   : > { %v420_v58 = vpop.xlane.xlu1 %419  ;;  %v620_v62 = vmul.f32 1.442695, %v618_v57 }
 0x2df   : > { %v424_v60 = vsub.f32 %v409_v42, %v420_v58 }
 0x2e1   : > { %v426_v63 = vmul.f32 1.442695, %v424_v60 }
 0x2e2   : > { %v819_v0 = vpop.xlane.xlu1 %818 }
 0x2e3   : > { %1670 = vpow2.f32 %v426_v63  ;;  %v816_v2 = vpop.xlane.xlu0 %815  ;;  %v821_v3 = vsub.f32 %v1465_v49, %v819_v0 }
 0x2e4   : > { %1672 = vpow2.f32 %v428_v61  ;;  %v820_v4 = vsub.f32 %v805_v50, %v816_v2 }
 0x2e5   : > { %1674 = vpow2.f32 %v620_v62  ;;  %v824_v8 = vmul.f32 1.442695, %v821_v3 }
 0x2e6   : > { %v822_v5 = vmul.f32 1.442695, %v820_v4  ;;  %v1657_v6 = vpop.permute.xlu1 %1656  ;;  %1676 = vpow2.f32 %v622_v1 }
 0x2e7   : > { %v1652_v7 = vpop.permute.xlu0 %1651  ;;  %v1659_v12 = vunpack.i.h.bf16 %v1657_v6  ;;  %v1658_v13 = vunpack.i.l.bf16 %v1657_v6  ;;  %v1156_v6 = vld [vmem:[%s2109_s2 + $0x8] sm:$0xff] }
 0x2e8   : > { %1678 = vpow2.f32 %v822_v5  ;;  %v1654_v9 = vunpack.i.h.bf16 %v1652_v7  ;;  %v1653_v10 = vunpack.i.l.bf16 %v1652_v7  ;;  %v1155_v5 = vld [vmem:[%s2109_s2] sm:$0xff]  ;;  %v1157_v7 = vld [vmem:[%s2109_s2 + $0x10] sm:$0xff] }
 0x2e9   : > { %1680 = vpow2.f32 %v824_v8  ;;  %v1540_v18 = vpack.c.bf16 %v1659_v12, %v1658_v13  ;;  %v1554_v8 = vpack.c.bf16 %v1156_v6, %v1155_v5  ;;  %v1160_v12 = vld [vmem:[%s2109_s2 + $0x28] sm:$0xff] }
 0x2ea   : > { %v1530_v11 = vpack.c.bf16 %v1654_v9, %v1653_v10  ;;  %v1662_v14 = vpop.permute.xlu1 %1661  ;;  %v1158_v9 = vld [vmem:[%s2109_s2 + $0x18] sm:$0xff] }
 0x2eb   : > { %v1664_v19 = vunpack.i.h.bf16 %v1662_v14  ;;  %v1663_v20 = vunpack.i.l.bf16 %v1662_v14  ;;  %v924_v26 = vpop.permute.xlu0 %923  ;;  %v1558_v10 = vpack.c.bf16 %v1158_v9, %v1157_v7 }
 0x2ec   : > { %1531 = vmatprep.subr.bf16.mxu1 %v1530_v11 }
 0x2ed   : > { %v1971_v15 = vpop.eup %1670  ;;  %v1544_v24 = vpack.c.bf16 %v1664_v19, %v1663_v20 }
 0x2ee   : > { %v1973_v16 = vpop.eup %1672  ;;  %1442 = vmatprep.mubr.msk.f32.mxu1 %vm332_vm1, %v1971_v15  ;;  %v926_v27 = vpop.permute.xlu1 %925  ;;  %v430_v58 = vsel %vm332_vm1, %v1971_v15, 0.0  ;;  %v1161_v15 = vld [vmem:[%s2109_s2 + $0x30] sm:$0xff] }
 0x2ef   : > { %v1675_v17 = vpop.eup %1674  ;;  %1443 = vmatmul.mubr.msk.f32.vlgmr.msra.gmra.mrb[6].mxu1 %vm332_vm1, %v1973_v16  ;;  %v433_v59 = vsel %vm332_vm1, %v1973_v16, 0.0  ;;  %v1162_v16 = vld [vmem:[%s2109_s2 + $0x38] sm:$0xff] }
 0x2f0   : > { %1533 = vmatpush3.bf16.msra.mxu1 %v1530_v11  ;;  %1456 = vmatprep.mubr.msk.f32.mxu1 %vm332_vm1, %v1675_v17  ;;  %v1677_v21 = vpop.eup %1676  ;;  %v624_v28 = vsel %vm332_vm1, %v1675_v17, 0.0  ;;  %v1159_v11 = vld [vmem:[%s2109_s2 + $0x20] sm:$0xff] }
 0x2f1   : > { %1541 = vmatprep.subr.bf16.mxu1 %v1540_v18  ;;  %v627_v39 = vsel %vm332_vm1, %v1677_v21, 0.0  ;;  %v1562_v13 = vpack.c.bf16 %v1160_v12, %v1159_v11 }
 0x2f2   : > { %v1679_v23 = vpop.eup %1678 }
 0x2f3   : > { %1457 = vmatmul.mubr.msk.f32.vlgmr.msra.gmra.mrb[8].mxu1 %vm332_vm1, %v1677_v21  ;;  %v1681_v25 = vpop.eup %1680  ;;  %v826_v40 = vsel %vm332_vm1, %v1679_v23, 0.0 }
 0x2f4   : > { %1543 = vmatpush3.bf16.msra.mxu1 %v1540_v18  ;;  %1470 = vmatprep.mubr.msk.f32.mxu1 %vm332_vm1, %v1679_v23  ;;  %v829_v41 = vsel %vm332_vm1, %v1681_v25, 0.0  ;;  %v1566_v18 = vpack.c.bf16 %v1162_v16, %v1161_v15 }
 0x2f5   : > { %1546 = vmatprep.subr.msk.bf16.mxu1 %vm1934_vm3, %v1544_v24 }
 0x2f7   : > { %1471 = vmatmul.mubr.msk.f32.vlgmr.msra.gmra.mrb[10].mxu1 %vm332_vm1, %v1681_v25 }
 0x2f8   : > { %1477 = vmatprep.mubr.msk.f32.mxu1 %vm332_vm1, %v924_v26 }
 0x2fd   : > { %1549 = vmatpush3.bf16.xpose.msk.msra.mxu1 %vm1934_vm3, %v1544_v24 }
 0x304   : > { %1478 = vmatmul.mubr.msk.f32.vlgmr.msra.gmra.mrb[12].mxu1 %vm332_vm1, %v926_v27 }
 0x3c2   : > { %v1989_v29 = vpop.f32.mrb[6].mxu1 }
 0x3c3   : > { %v1991_v30 = vpop.f32.mrb[7].mxu1 }
 0x3c6   : > { %v1458_v31 = vpop.f32.mrb[8].mxu1 }
 0x3c7   : > { %v710_v32 = vpop.f32.mrb[9].mxu1 }
 0x3ca   : > { %v1472_v33 = vpop.f32.mrb[10].mxu1 }
 0x3cb   : > { %v910_v34 = vpop.f32.mrb[11].mxu1 }
 0x3d7   : > { %v1479_v35 = vpop.f32.mrb[12].mxu1 }
 0x3d8   : > { %v1005_v36 = vpop.f32.mrb[13].mxu1  ;;  %v1017_v37 = vsel %vm332_vm1, %v1479_v35, -inf }
 0x3d9   : > { %1018 = vmax.xlane.f32.xlu1 %v1017_v37  ;;  %v1014_v38 = vsel %vm332_vm1, %v1005_v36, -inf }
 0x3da   : > { %1015 = vmax.xlane.f32.xlu0 %v1014_v38 }
 0x3dd   : > { %625 = vadd.xlane.f32.xlu1 %v624_v28 }
 0x3e1   : > { %628 = vadd.xlane.f32.xlu1 %v627_v39 }
 0x3e5   : > { %827 = vadd.xlane.f32.xlu1 %v826_v40 }
 0x3e9   : > { %830 = vadd.xlane.f32.xlu1 %v829_v41 }
 0x3f0   : > { %1666 = vrot.lane.b32.xlu0 %v1925_v22, %s1789_s14 }
 0x466   : > { %v1019_v42 = vpop.xlane.xlu1 %1018 }
 0x467   : > { %v1021_v43 = vsub.f32 %v1479_v35, %v1019_v42  ;;  %v1016_v44 = vpop.xlane.xlu0 %1015 }
 0x468   : > { %v1020_v45 = vsub.f32 %v1005_v36, %v1016_v44 }
 0x469   : > { %v1024_v46 = vmul.f32 1.442695, %v1021_v43 }
 0x46a   : > { %v1022_v47 = vmul.f32 1.442695, %v1020_v45  ;;  %v626_v52 = vpop.xlane.xlu1 %625 }
 0x46b   : > { %1682 = vpow2.f32 %v1024_v46  ;;  %v1667_v48 = vpop.permute.xlu0 %1666 }
 0x46c   : > { %1684 = vpow2.f32 %v1022_v47  ;;  %v1669_v49 = vunpack.i.h.bf16 %v1667_v48  ;;  %v1668_v50 = vunpack.i.l.bf16 %v1667_v48 }
 0x46e   : > { %v1550_v51 = vpack.c.bf16 %v1669_v49, %v1668_v50  ;;  %v629_v54 = vpop.xlane.xlu1 %628 }
 0x470   : > { %1551 = vmatprep.subr.bf16.mxu0 %v1550_v51 }
 0x471   : > { %1553 = vmatpush3.bf16.msra.mxu0 %v1550_v51 }
 0x472   : > { %v828_v57 = vpop.xlane.xlu1 %827  ;;  %1555 = vmatprep.subr.bf16.mxu0 %v1554_v8 }
 0x473   : > { %1686 = vrcp.f32 %v828_v57 }
 0x474   : > { %1688 = vrcp.f32 %v626_v52 }
 0x475   : > { %v1683_v53 = vpop.eup %1682  ;;  %1690 = vrcp.f32 %v629_v54 }
 0x476   : > { %v1685_v55 = vpop.eup %1684  ;;  %v1029_v22 = vsel %vm332_vm1, %v1683_v53, 0.0  ;;  %v831_v60 = vpop.xlane.xlu1 %830 }
 0x477   : > { %1030 = vadd.xlane.f32.xlu0 %v1029_v22  ;;  %1484 = vmatprep.mubr.msk.f32.mxu0 %vm332_vm1, %v1685_v55  ;;  %v1026_v56 = vsel %vm332_vm1, %v1685_v55, 0.0  ;;  %1692 = vrcp.f32 %v831_v60 }
 0x478   : > { %1027 = vadd.xlane.f32.xlu1 %v1026_v56  ;;  %1485 = vmatmul.mubr.msk.f32.vlgmr.msra.gmra.mrb[4].mxu0 %vm332_vm1, %v1683_v53 }
 0x479   : > { %1557 = vmatpush3.bf16.msra.mxu0 %v1554_v8 }
 0x47a   : > { %1559 = vmatprep.subr.bf16.mxu0 %v1558_v10 }
 0x47c   : > { %431 = vadd.xlane.f32.xlu1 %v430_v58 }
 0x47d   : > { %v1687_v61 = vpop.eup %1686  ;;  %1561 = vmatpush3.bf16.msra.mxu0 %v1558_v10 }
 0x47e   : > { %v921_v62 = vmul.f32 %v1687_v61, %v910_v34  ;;  %v1689_v63 = vpop.eup %1688  ;;  %1563 = vmatprep.subr.bf16.mxu0 %v1562_v13 }
 0x47f   : > { %v721_v0 = vmul.f32 %v1689_v63, %v710_v32  ;;  %v1691_v1 = vpop.eup %1690 }
 0x480   : > { %434 = vadd.xlane.f32.xlu1 %v433_v59  ;;  %v722_v2 = vmul.f32 %v1691_v1, %v1458_v31 }
 0x481   : > { %v1693_v3 = vpop.eup %1692  ;;  %1565 = vmatpush3.bf16.msra.mxu0 %v1562_v13 }
 0x482   : > { %v922_v4 = vmul.f32 %v1693_v3, %v1472_v33  ;;  %1567 = vmatprep.subr.bf16.mxu0 %v1566_v18 }
 0x485   : > { %1569 = vmatpush3.bf16.msra.mxu0 %v1566_v18 }
 0x48d   : > { %1133 = vrot.lane.b32.xlu0 %v921_v62, %s1784_s9 }
 0x491   : > { %1125 = vrot.lane.b32.xlu1 %v721_v0, %s1788_s13 }
 0x495   : > { %1127 = vrot.lane.b32.xlu1 %v722_v2, %s1788_s13  ;;  %s1708_s13 = scalar_lea.vmem %s1707_s11, 512 }
 0x499   : > { %1135 = vrot.lane.b32.xlu1 %v922_v4, %s1784_s9 }
 0x504   : > { %v1031_v17 = vpop.xlane.xlu0 %1030 }
 0x505   : > { %v1028_v14 = vpop.xlane.xlu1 %1027 }
 0x506   : > { %1694 = vrcp.f32 %v1028_v14 }
 0x507   : > { %1696 = vrcp.f32 %v1031_v17 }
 0x508   : > { %v1134_v28 = vpop.permute.xlu0 %1133 }
 0x509   : > { %v432_v26 = vpop.xlane.xlu1 %431 }
 0x50a   : > { %1698 = vrcp.f32 %v432_v26 }
 0x50d   : > { %v435_v27 = vpop.xlane.xlu1 %434 }
 0x50e   : > { %1700 = vrcp.f32 %v435_v27 }
 0x510   : > { %v1695_v20 = vpop.eup %1694 }
 0x511   : > { %v1697_v24 = vpop.eup %1696  ;;  %v1126_v31 = vpop.permute.xlu1 %1125 }
 0x514   : > { %v1699_v32 = vpop.eup %1698 }
 0x515   : > { %v1128_v33 = vpop.permute.xlu1 %1127  ;;  %v519_v34 = vmul.f32 %v1699_v32, %v1991_v30 }
 0x517   : > { %v1147_v37 = vsel %vm332_vm1, %v519_v34, %v1126_v31 }
 0x518   : > { %v1701_v35 = vpop.eup %1700  ;;  %v1150_v39 = vsel %vm225_vm0, %v1147_v37, %v1134_v28 }
 0x519   : > { %v1136_v36 = vpop.permute.xlu1 %1135  ;;  %v520_v38 = vmul.f32 %v1701_v35, %v1989_v29  ;;  %v1379_v29 = vld [vmem:[%s2110_s3] ss:$0 sm:$0xff] }
 0x51b   : > { %v1148_v41 = vsel %vm332_vm1, %v520_v38, %v1128_v33 }
 0x51c   : > { %v1151_v30 = vsel %vm225_vm0, %v1148_v41, %v1136_v36 }
 0x54b   : > { %v1486_v19 = vpop.f32.mrb[4].mxu0 }
 0x54c   : > { %v1110_v21 = vpop.f32.mrb[5].mxu0  ;;  %v1122_v25 = vmul.f32 %v1697_v24, %v1486_v19 }
 0x54d   : > { %v1121_v23 = vmul.f32 %v1695_v20, %v1110_v21 }
 0x54f   : > { %1141 = vrot.lane.b32.xlu1 %v1121_v23, %s1787_s12 }
 0x553   : > { %1143 = vrot.lane.b32.xlu1 %v1122_v25, %s1787_s12  ;;  %s202_s12 = sand.u32 1, %s1764_s16  }
 0x554   : > { %s1350_s22 = sshll.u32 %s202_s12, 4  ;;  %s2061_s9 = scalar_lea.sflag [#allocation4], %s202_s12 }
 0x555   : > { %s204_s29 = scalar_lea.vmem [#allocation3], %s1350_s22 }
 0x556   : > { %s1270_s30 = sshll.u32 %s204_s29, 4  ;;  %s2052_s30 = int_to_ptr.vmem [resolvable:$true] %s1270_s30 }
 0x557   : > { %s1702_s18 = scalar_lea.vmem %s2052_s30, 256  ;;  %p1709_p1 = scmp.lt.s32.totalorder %s2052_s30, %s1707_s11 }
 0x558   : > { %p1703_p12 = scmp.ne.s32.totalorder %s2052_s30, %s1702_s18  ;;  %p1710_p2 = scmp.lt.s32.totalorder %s1708_s13, %s1702_s18 }
 0x55a   : > { %p1704_p13 = pnand %p1703_p12, %p1858_p4  ;;  %p1711_p3 = por %p1710_p2, %p1709_p1 }
 0x55c   : > { %p1705_p0 = pneg %p1704_p13 }
 0x55e   : > { %p1712_p5 = pnand %p1711_p3, %p1705_p0 }
 0x5c1   : > { %v1142_v40 = vpop.permute.xlu1 %1141 }
 0x5c2   : > { %v1153_v42 = vsel %vm1152_vm4, %v1150_v39, %v1142_v40 }
 0x5c3   : > { %1503 = vmatprep.mubr.msk.f32.mxu0 %vm310_vm2, %v1153_v42 }
 0x5c5   : > { %v1144_v43 = vpop.permute.xlu1 %1143 }
 0x5c6   : > { %v1154_v44 = vsel %vm1152_vm4, %v1151_v30, %v1144_v43 }
 0x5c7   : > { %1504 = vmatmul.mubr.msk.f32.vlgmr.msra.gmra.mrb[6].mxu0 %vm310_vm2, %v1154_v44 }
 0x69a   : > { %v1505_v45 = vpop.f32.mrb[6].mxu0 }
 0x69b   : > { %v1249_v46 = vadd.f32 %v1505_v45, %v1379_v29  ;;  %v1243_v47 = vpop.f32.mrb[7].mxu0 }
 0x69c   : > { %v1244_v48 = vadd.f32 %v1379_v29, %v1243_v47 }
 0x69d   : > { %1253 = vst.msk [vmem:[%s204_s29 + $0x8] sm:$0xff] %vm225_vm0, %v1249_v46 }
 0x69e   : > { %1252 = vst.msk [vmem:[%s204_s29] sm:$0xff] %vm225_vm0, %v1244_v48 }
 0x69f   : > { %1715 = shalt.err (!%p1712_p5)
}
 0x6a0   : > { %s1716_s14 = scalar_lea.hbm %s2057_s8, 256  ;;  %s1720_s22 = scalar_lea.hbm %s2111_s4, 512 }
 0x6a1   : > { %p1717_p6 = scmp.ne.s32.totalorder %s2057_s8, %s1716_s14  ;;  %p1721_p10 = scmp.lt.u32.totalorder %s2057_s8, %s2111_s4 }
 0x6a2   : > { %p1722_p11 = scmp.lt.u32.totalorder %s1720_s22, %s1716_s14  ;;  %p1724_p13 = scmp.lt.u32.totalorder %s1716_s14, %s2057_s8 }
 0x6a3   : > { %p1718_p7 = pnand %p1717_p6, %p1858_p4 }
 0x6a4   : > { %p1723_p12 = por %p1722_p11, %p1721_p10 }
 0x6a5   : > { %p1719_p9 = pneg %p1718_p7 }
 0x6a6   : > { %p1725_p0 = por %p1724_p13, %p1723_p12 }
 0x6a8   : > { %p1726_p1 = pnand %p1725_p0, %p1719_p9 }
 0x6aa   : > { %1729 = shalt.err (!%p1726_p1)
}
 0x6ab   : > { %s1791_s29 = smov 128   ;;  %s1792_s5 = smov 8  }
 0x6ac   : > { %1570 = dma.vmem_to_hbm [thread:$0]  (%p1858_p4), %s2052_s30, 256, %s2057_s8, %s2061_s9, %s1791_s29, %s1791_s29, %s1792_s5  }
 0x6ad PF: > { %p1576_p2 = scmp.ge.s32.totalorder %s1780_s20, 2  ;;  %s1285_s6 = sand.u32 1, %s1760_s15  }
 0x6ae   : > { %s1286_s7 = scalar_lea.sflag [#allocation4], %s1285_s6 }
 0x6af   : > { %p1573_p3 = pnand %p1576_p2, %p1865_p8 }
 0x6b1   : > { %1755 = dma.done.wait (!%p1573_p3), %s1286_s7, 256  }
 0x6b2   : > { %1757 = vsyncadd (!%p1573_p3), %s1286_s7, 4294967040  ;;  %s17_s20 = sadd.s32 1, %s1780_s20   ;;  %s2116_s15 = smov %s1764_s16 }
 0x6b3   : > { %p14_p5 = scmp.ge.s32.totalorder %s17_s20, 4   ;;  %s2117_s16 = smov %s1768_s17 }
 0x6b4   : > { %s2118_s17 = smov %s1871_s28  ;;  %s2119_s18 = smov %s1776_s19 }
 0x6b5   : > { %s2120_s19 = smov %s2122_s23  ;;  %16 = sbr.rel (!%p14_p5) target bundleno = 4 (0x4), region = 76 }
 0x6bc   :  { %1291 = vsyncpa [#allocation4], 1 }
 0x6bd   :  { %1293 = vsyncpa [#allocation4 + $0x1], 1 }

</bundles_post_ra>
